<compile_context>
chip_gen: v6e
topology: v6e:2x2x1
jax: 0.10.0
libtpu: 0.0.40
codegen_flags: <defaults>
</compile_context>

<pallas_src>
import math
from functools import partial

import jax
import jax.numpy as jnp
from jax.experimental import pallas as pl
from jax.experimental.pallas import tpu as pltpu


def _attention_kernel(q_ref, k_ref, v_ref, out_ref, attn_ref, *,
                      mxu_dtype, exp_dtype):
    # Blocks: q (BB, TQ, D), k (BB, K, D), v (BB, K, V).
    q = q_ref[...]
    k = k_ref[...]
    v = v_ref[...]

    d = q.shape[-1]
    # Fold the 1/sqrt(d) scale into q (scales BB*TQ*D elements, not BB*TQ*K).
    q = q * jnp.asarray(1.0 / math.sqrt(d), dtype=q.dtype)

    # Optional low-precision MXU operands (f32 accumulation preserved below).
    if mxu_dtype is not None:
        mxu_dt = jnp.dtype(mxu_dtype)
        if jnp.dtype(q.dtype).itemsize > mxu_dt.itemsize:
            q = q.astype(mxu_dt)
            k = k.astype(mxu_dt)
        if jnp.dtype(v.dtype).itemsize > mxu_dt.itemsize:
            v = v.astype(mxu_dt)

    # scores = Q @ K^T: contract last dims directly (no transpose), batched
    # over the fused-batch axis; f32 accumulation on the MXU.
    scores = jax.lax.dot_general(
        q, k,
        dimension_numbers=(((2,), (2,)), ((0,), (0,))),
        preferred_element_type=jnp.float32)              # (BB, TQ, K) f32

    # Softmax over the last axis (valid_lens=None path of masked_softmax).
    m = jnp.max(scores, axis=-1, keepdims=True)
    x = scores - m
    if exp_dtype is not None:
        x = x.astype(exp_dtype)                          # bf16 exp on v6e/v7x
    e = jnp.exp(x)
    denom = jnp.sum(e, axis=-1, keepdims=True, dtype=jnp.float32)

    # EUP approximate reciprocal (free slot) + one Newton step on the tiny
    # (BB, TQ, 1) tensor so the returned weights sum to 1 to f32 accuracy.
    inv = pl.reciprocal(denom, approx=True)
    inv = inv * (2.0 - denom * inv)

    w = e * inv                                          # (BB, TQ, K) f32

    # TODO(synk): training-mode nn.Dropout on the weights is not implemented
    # (identity at inference); it would use pltpu.prng_random_bits.
    w_lo = w.astype(attn_ref.dtype)
    attn_ref[...] = w_lo

    # Reuse the single low-precision cast for the PV matmul when possible.
    pv = w_lo if w_lo.dtype == v.dtype else w.astype(v.dtype)

    # attn_score = softmax(scores) @ V; f32 accumulation on the MXU.
    out_ref[...] = jax.lax.dot_general(
        pv, v,
        dimension_numbers=(((2,), (1,)), ((0,), (0,))),
        preferred_element_type=jnp.float32).astype(out_ref.dtype)


def _divisors_desc(n, cap):
    cap = max(1, min(n, cap))
    return [d for d in range(cap, 0, -1) if n % d == 0]


def _tq_candidates(q, cap, align):
    cap = max(1, min(q, cap))
    cands = [t for t in range(cap, 0, -1)
             if q % t == 0 and (t % align == 0 or t == q)]
    if not cands:
        cands = [t for t in range(cap, 0, -1) if q % t == 0]
    return cands


def _vmem_capacity_bytes():
    try:
        info = pltpu.get_tpu_info()
        return int(getattr(info, "vmem_capacity_bytes", 64 << 20))
    except Exception:
        return 64 << 20  # v7x-safe fallback (64 MiB / TensorCore)


def _footprint_bytes(bb, tq, K, D, V, q_isz, k_isz, v_isz, o_isz, w_isz):
    blocks = (bb * tq * D * q_isz        # q block
              + bb * K * D * k_isz       # k block
              + bb * K * V * v_isz       # v block
              + bb * tq * V * o_isz      # attn_score block
              + bb * tq * K * w_isz)     # attn_weights block
    interm = 3 * bb * tq * K * 4         # f32 scores / e / w intermediates
    return 2 * blocks + interm           # double-buffered blocks + intermediates


def dot_product_attention_g(queries, keys, values, valid_lens=None, *,
                            batch_block=8, q_block=256,
                            weights_dtype=None, mxu_dtype=None, exp_dtype=None):
    """Pallas implementation of DotProductAttention_G.forward (valid_lens=None)."""
    # TODO(synk): masked path (valid_lens) of masked_softmax is not implemented.
    assert valid_lens is None, "masked path (valid_lens) not implemented"
    B, Q, D = queries.shape
    Bk, K, Dk = keys.shape
    Bv, Kv, V = values.shape
    assert B == Bk == Bv and D == Dk and K == Kv

    out_dtype = queries.dtype
    w_dtype = jnp.dtype(out_dtype if weights_dtype is None else weights_dtype)

    q_isz = jnp.dtype(queries.dtype).itemsize
    k_isz = jnp.dtype(keys.dtype).itemsize
    v_isz = jnp.dtype(values.dtype).itemsize
    o_isz = jnp.dtype(out_dtype).itemsize
    w_isz = w_dtype.itemsize

    # TQ is the second-minor dim of every q/out/attn tile: align it to the
    # sublane packing of the input dtype (8 for f32, 16 for bf16, 32 for int8).
    align = max(8, 32 // q_isz)

    # Budget-driven tile derivation (shrink BB first, then TQ).
    vmem_cap = _vmem_capacity_bytes()
    budget = int(vmem_cap * 0.55)
    bb_cands = _divisors_desc(B, batch_block)
    tq_cands = _tq_candidates(Q, q_block, align)
    bi = ti = 0
    BB, TQ = bb_cands[bi], tq_cands[ti]
    while _footprint_bytes(BB, TQ, K, D, V,
                           q_isz, k_isz, v_isz, o_isz, w_isz) > budget:
        if bi + 1 < len(bb_cands):
            bi += 1
            BB = bb_cands[bi]
        elif ti + 1 < len(tq_cands):
            ti += 1
            TQ = tq_cands[ti]
        else:
            break

    footprint = _footprint_bytes(BB, TQ, K, D, V,
                                 q_isz, k_isz, v_isz, o_isz, w_isz)
    vmem_limit = int(min(vmem_cap * 0.9, footprint + (8 << 20)))
    vmem_limit = max(vmem_limit, 16 << 20)

    out_shapes = (
        jax.ShapeDtypeStruct((B, Q, V), out_dtype),   # attn_score
        jax.ShapeDtypeStruct((B, Q, K), w_dtype),     # attention_weights
    )

    grid_spec = pltpu.PrefetchScalarGridSpec(
        num_scalar_prefetch=0,
        grid=(B // BB, Q // TQ),
        in_specs=[
            pl.BlockSpec((BB, TQ, D), lambda b, qi: (b, qi, 0)),
            # K/V block index constant along the Q axis -> stays VMEM-resident.
            pl.BlockSpec((BB, K, D), lambda b, qi: (b, 0, 0)),
            pl.BlockSpec((BB, K, V), lambda b, qi: (b, 0, 0)),
        ],
        out_specs=[
            pl.BlockSpec((BB, TQ, V), lambda b, qi: (b, qi, 0)),
            pl.BlockSpec((BB, TQ, K), lambda b, qi: (b, qi, 0)),
        ],
    )

    cost = pl.CostEstimate(
        flops=2 * B * Q * K * (D + V),
        transcendentals=B * Q * K,
        bytes_accessed=(B * Q * D * q_isz + B * K * D * k_isz
                        + B * K * V * v_isz + B * Q * V * o_isz
                        + B * Q * K * w_isz),
    )

    kernel = partial(_attention_kernel, mxu_dtype=mxu_dtype, exp_dtype=exp_dtype)

    attn_score, attn_w = pl.pallas_call(
        kernel,
        out_shape=out_shapes,
        grid_spec=grid_spec,
        compiler_params=pltpu.CompilerParams(
            # Batch axis only across cores: keeps K/V blocks resident over the
            # inner Q sweep on megacore parts; free on single-TC chips.
            dimension_semantics=("parallel", "arbitrary"),
            vmem_limit_bytes=vmem_limit),
        cost_estimate=cost,
    )(queries, keys, values)
    return attn_score, attn_w


def _reference(queries, keys, values):
    d = queries.shape[-1]
    scores = jnp.einsum("bqd,bkd->bqk", queries, keys) / math.sqrt(d)
    w = jax.nn.softmax(scores, axis=-1)
    return jnp.einsum("bqk,bkv->bqv", w, values), w


if __name__ == "__main__":
    key = jax.random.PRNGKey(0)
    kq, kk, kv = jax.random.split(key, 3)

    # Small shapes consistent with the module's bmm convention.
    B, Q, K, D, V = 2, 8, 8, 32, 32
    queries = jax.random.normal(kq, (B, Q, D), dtype=jnp.float32)
    keys = jax.random.normal(kk, (B, K, D), dtype=jnp.float32)
    values = jax.random.normal(kv, (B, K, V), dtype=jnp.float32)

    attn_score, attn_w = dot_product_attention_g(queries, keys, values)
    jax.block_until_ready((attn_score, attn_w))

    ref_score, ref_w = _reference(queries, keys, values)
    assert jnp.allclose(attn_score, ref_score, atol=1e-3, rtol=1e-3)
    assert jnp.allclose(attn_w, ref_w, atol=1e-3, rtol=1e-3)

    # Exercise the batch-fused + Q-tiled path (grid with >1 step on each axis).
    B2, Q2, K2, D2, V2 = 4, 256, 512, 64, 64
    kq2, kk2, kv2 = jax.random.split(jax.random.PRNGKey(1), 3)
    q2 = jax.random.normal(kq2, (B2, Q2, D2), dtype=jnp.float32)
    k2 = jax.random.normal(kk2, (B2, K2, D2), dtype=jnp.float32)
    v2 = jax.random.normal(kv2, (B2, K2, V2), dtype=jnp.float32)
    s2, w2 = dot_product_attention_g(q2, k2, v2, batch_block=2, q_block=128)
    jax.block_until_ready((s2, w2))
    rs2, rw2 = _reference(q2, k2, v2)
    assert jnp.allclose(s2, rs2, atol=1e-3, rtol=1e-3)
    assert jnp.allclose(w2, rw2, atol=1e-3, rtol=1e-3)

    print("KERNEL_OK")
</pallas_src>

<mosaic_0001>
module attributes {stable_mosaic.version = 11 : i64} {
  func.func @_attention_kernel(%arg0: i32, %arg1: i32, %arg2: memref<2x8x32xf32, #tpu.memory_space<vmem>>, %arg3: memref<2x8x32xf32, #tpu.memory_space<vmem>>, %arg4: memref<2x8x32xf32, #tpu.memory_space<vmem>>, %arg5: memref<2x8x32xf32, #tpu.memory_space<vmem>>, %arg6: memref<2x8x8xf32, #tpu.memory_space<vmem>>) attributes {dimension_semantics = [#tpu.dimension_semantics<parallel>, #tpu.dimension_semantics<arbitrary>], iteration_bounds = array<i64: 1, 1>, scalar_prefetch = 0 : i64, scratch_operands = 0 : i64, tpu.core_type = #tpu.core_type<tc>, window_params = [{transform_indices = @transform_0, window_bounds = array<i64: 2, 8, 32>}, {transform_indices = @transform_1, window_bounds = array<i64: 2, 8, 32>}, {transform_indices = @transform_2, window_bounds = array<i64: 2, 8, 32>}, {transform_indices = @transform_3, window_bounds = array<i64: 2, 8, 32>}, {transform_indices = @transform_4, window_bounds = array<i64: 2, 8, 8>}]} {
    %c0 = arith.constant 0 : index
    %c0_0 = arith.constant 0 : index
    %c0_1 = arith.constant 0 : index
    %0 = vector.load %arg2[%c0, %c0_0, %c0_1] : memref<2x8x32xf32, #tpu.memory_space<vmem>>, vector<2x8x32xf32>
    %c0_2 = arith.constant 0 : index
    %c0_3 = arith.constant 0 : index
    %c0_4 = arith.constant 0 : index
    %1 = vector.load %arg3[%c0_2, %c0_3, %c0_4] : memref<2x8x32xf32, #tpu.memory_space<vmem>>, vector<2x8x32xf32>
    %c0_5 = arith.constant 0 : index
    %c0_6 = arith.constant 0 : index
    %c0_7 = arith.constant 0 : index
    %2 = vector.load %arg4[%c0_5, %c0_6, %c0_7] : memref<2x8x32xf32, #tpu.memory_space<vmem>>, vector<2x8x32xf32>
    %cst = arith.constant 0.176776692 : f32
    %3 = vector.broadcast %cst : f32 to vector<2x8x32xf32>
    %4 = arith.mulf %0, %3 : vector<2x8x32xf32>
    %cst_8 = arith.constant dense<0.000000e+00> : vector<2x8x8xf32>
    %5 = tpu.matmul %4, %1, %cst_8 {dimension_numbers = #tpu.dot_dimension_numbers<[2], [2], [1], [1], [0, 0, 0, 1, 1, 1], [0], [0]>} : vector<2x8x32xf32>, vector<2x8x32xf32>, vector<2x8x8xf32> -> vector<2x8x8xf32>
    %cst_9 = arith.constant dense<0xFF800000> : vector<2x8xf32>
    %6 = vector.multi_reduction <maximumf>, %5, %cst_9 [2] : vector<2x8x8xf32> to vector<2x8xf32>
    %7 = vector.shape_cast %6 : vector<2x8xf32> to vector<2x8x1xf32>
    %8 = vector.broadcast %7 : vector<2x8x1xf32> to vector<2x8x8xf32>
    %9 = arith.subf %5, %8 : vector<2x8x8xf32>
    %10 = math.exp %9 : vector<2x8x8xf32>
    %cst_10 = arith.constant dense<0.000000e+00> : vector<2x8xf32>
    %11 = vector.multi_reduction <add>, %10, %cst_10 [2] : vector<2x8x8xf32> to vector<2x8xf32>
    %12 = vector.shape_cast %11 : vector<2x8xf32> to vector<2x8x1xf32>
    %13 = tpu.reciprocal %12 {approx = true} : vector<2x8x1xf32> -> vector<2x8x1xf32>
    %14 = arith.mulf %12, %13 : vector<2x8x1xf32>
    %cst_11 = arith.constant 2.000000e+00 : f32
    %15 = vector.broadcast %cst_11 : f32 to vector<2x8x1xf32>
    %16 = arith.subf %15, %14 : vector<2x8x1xf32>
    %17 = arith.mulf %13, %16 : vector<2x8x1xf32>
    %18 = vector.broadcast %17 : vector<2x8x1xf32> to vector<2x8x8xf32>
    %19 = arith.mulf %10, %18 : vector<2x8x8xf32>
    %c0_12 = arith.constant 0 : index
    %c0_13 = arith.constant 0 : index
    %c0_14 = arith.constant 0 : index
    %20 = vector.load %arg6[%c0_12, %c0_13, %c0_14] : memref<2x8x8xf32, #tpu.memory_space<vmem>>, vector<2x8x8xf32>
    tpu.vector_store %arg6[%c0_12, %c0_13, %c0_14], %19 {strides = array<i32>} : memref<2x8x8xf32, #tpu.memory_space<vmem>>, vector<2x8x8xf32>,
    %cst_15 = arith.constant dense<0.000000e+00> : vector<2x8x32xf32>
    %21 = tpu.matmul %19, %2, %cst_15 {dimension_numbers = #tpu.dot_dimension_numbers<[2], [1], [1], [2], [0, 0, 0, 1, 1, 2], [0], [0]>} : vector<2x8x8xf32>, vector<2x8x32xf32>, vector<2x8x32xf32> -> vector<2x8x32xf32>
    %c0_16 = arith.constant 0 : index
    %c0_17 = arith.constant 0 : index
    %c0_18 = arith.constant 0 : index
    %22 = vector.load %arg5[%c0_16, %c0_17, %c0_18] : memref<2x8x32xf32, #tpu.memory_space<vmem>>, vector<2x8x32xf32>
    tpu.vector_store %arg5[%c0_16, %c0_17, %c0_18], %21 {strides = array<i32>} : memref<2x8x32xf32, #tpu.memory_space<vmem>>, vector<2x8x32xf32>,
    return
  }
  func.func @transform_0(%arg0: i32, %arg1: i32) -> (i32, i32, i32) {
    %c0_i32 = arith.constant 0 : i32
    %c0_i32_0 = arith.constant 0 : i32
    return %arg0, %arg1, %c0_i32 : i32, i32, i32
  }
  func.func @transform_1(%arg0: i32, %arg1: i32) -> (i32, i32, i32) {
    %c0_i32 = arith.constant 0 : i32
    %c0_i32_0 = arith.constant 0 : i32
    %c0_i32_1 = arith.constant 0 : i32
    return %arg0, %c0_i32, %c0_i32_0 : i32, i32, i32
  }
  func.func @transform_2(%arg0: i32, %arg1: i32) -> (i32, i32, i32) {
    %c0_i32 = arith.constant 0 : i32
    %c0_i32_0 = arith.constant 0 : i32
    %c0_i32_1 = arith.constant 0 : i32
    return %arg0, %c0_i32, %c0_i32_0 : i32, i32, i32
  }
  func.func @transform_3(%arg0: i32, %arg1: i32) -> (i32, i32, i32) {
    %c0_i32 = arith.constant 0 : i32
    %c0_i32_0 = arith.constant 0 : i32
    return %arg0, %arg1, %c0_i32 : i32, i32, i32
  }
  func.func @transform_4(%arg0: i32, %arg1: i32) -> (i32, i32, i32) {
    %c0_i32 = arith.constant 0 : i32
    %c0_i32_0 = arith.constant 0 : i32
    return %arg0, %arg1, %c0_i32 : i32, i32, i32
  }
}

</mosaic_0001>

<bundles_post_ra>
// kernel: tpu_custom_call.1
= control target key start
LH: loop header
LB: loop body
LE: loop exit
PB: predicated region body
PF: predicated region fallthrough
CT: control target
= control target key end

     0   :  { %10 = vsyncpa [#allocation3], 0  ;;  %s674_s0 = inlined_call_operand.hbm [shape: f32[2,8,32], index: 0, kind: input, shape index: {}]   ;;  %s675_s1 = inlined_call_operand.hbm [shape: f32[2,8,32], index: 1, kind: input, shape index: {}]   ;;  %s676_s2 = inlined_call_operand.hbm [shape: f32[2,8,32], index: 2, kind: input, shape index: {}]   ;;  %s677_s3 = inlined_call_operand.hbm [shape: f32[2,8,32], index: 3, kind: output, shape index: {0}]   ;;  %s678_s4 = inlined_call_operand.hbm [shape: f32[2,8,8], index: 4, kind: output, shape index: {1}]  }
   0x1   :  { %11 = vsyncpa [#allocation6], 0 }
   0x2   :  { %12 = vsyncpa [#allocation4], 0 }
   0x3   :  { %13 = vsyncpa [#allocation10], 0  ;;  %s592_s15 = smov [#allocation5]   ;;  %s593_s17 = smov [#allocation2]  }
   0x4   :  { %s31_s16 = sshll.u32 %s592_s15, 4  ;;  %s19_s18 = sshll.u32 %s593_s17, 4  ;;  %s32_s16 = int_to_ptr.vmem [resolvable:$true] %s31_s16  ;;  %s20_s18 = int_to_ptr.vmem [resolvable:$true] %s19_s18 }
   0x5   :  { %s492_s19 = scalar_lea.vmem %s32_s16, 256  ;;  %p497_p1 = scmp.lt.s32.totalorder %s32_s16, %s32_s16 }
   0x6   :  { %p493_p0 = scmp.ne.s32.totalorder %s32_s16, %s492_s19  ;;  %p498_p2 = scmp.lt.s32.totalorder %s492_s19, %s492_s19 }
   0x8   :  { %p499_p3 = por %p498_p2, %p497_p1 }
   0xa   :  { %p500_p4 = pnand %p499_p3, %p493_p0 }
   0xc   :  { %503 = shalt.err (!%p500_p4)
}
   0xd   :  { %s594_s20 = smov 128   ;;  %s595_s21 = smov 8  }
   0xe   :  { %37 = dma.hbm_to_vmem [thread:$0]  %s675_s1, 256, %s32_s16, [#allocation6], %s594_s20, %s594_s20, %s595_s21  }
   0xf   :  { %s512_s24 = scalar_lea.vmem %s20_s18, 256  ;;  %p517_p6 = scmp.lt.s32.totalorder %s20_s18, %s20_s18 }
  0x10   :  { %p513_p5 = scmp.ne.s32.totalorder %s20_s18, %s512_s24  ;;  %p518_p7 = scmp.lt.s32.totalorder %s512_s24, %s512_s24 }
  0x12   :  { %p519_p8 = por %p518_p7, %p517_p6 }
  0x14   :  { %p520_p9 = pnand %p519_p8, %p513_p5 }
  0x16   :  { %523 = shalt.err (!%p520_p9)
}
  0x17   :  { %25 = dma.hbm_to_vmem [thread:$0]  %s674_s0, 256, %s20_s18, [#allocation3], %s594_s20, %s594_s20, %s595_s21  }
  0x18   :  { %s596_s27 = smov [#allocation7]  }
  0x19   :  { %s43_s28 = sshll.u32 %s596_s27, 4  ;;  %s44_s28 = int_to_ptr.vmem [resolvable:$true] %s43_s28 }
  0x1a   :  { %s532_s29 = scalar_lea.vmem %s44_s28, 256  ;;  %p537_p11 = scmp.lt.s32.totalorder %s44_s28, %s44_s28 }
  0x1b   :  { %p533_p10 = scmp.ne.s32.totalorder %s44_s28, %s532_s29  ;;  %p538_p12 = scmp.lt.s32.totalorder %s532_s29, %s532_s29 }
  0x1d   :  { %p539_p13 = por %p538_p12, %p537_p11 }
  0x1f   :  { %p540_p0 = pnand %p539_p13, %p533_p10 }
  0x21   :  { %543 = shalt.err (!%p540_p0)
}
  0x22   :  { %49 = dma.hbm_to_vmem [thread:$0]  %s676_s2, 256, %s44_s28, [#allocation6], %s594_s20, %s594_s20, %s595_s21  }
  0x23   :  { %584 = dma.done.wait [#allocation3], 256  }
  0x24   :  { %585 = vsyncadd [#allocation3], 4294967040 }
  0x25   :  { %586 = dma.done.wait [#allocation6], 512  }
  0x26   :  { %587 = vsyncadd [#allocation6], 4294966784  ;;  %v597_v0 = vmov 0.0   ;;  %vm598_vm0 = vmmov 0   ;;  %vm67_vm1 = vcmask 261120   ;;  %v61_v1 = vld [vmem:[#allocation5] sm:$0xff] }
  0x27   :  { %447 = vmatprep.subr.mxu0 %v597_v0  ;;  %452 = vmatprep.subr.mxu1 %v597_v0  ;;  %v62_v2 = vld [vmem:[#allocation5 + $0x8] sm:$0xff]  ;;  %v59_v3 = vld [vmem:[#allocation2] sm:$0xff]  ;;  %v60_v5 = vld [vmem:[#allocation2 + $0x8] sm:$0xff]  ;;  %vm220_vm2 = vcmask 64512   ;;  %s599_s0 = smov [#allocation9]  }
  0x28   :  { %449 = vmatprep.mubr.msk.f32.mxu0 %vm598_vm0, %v597_v0  ;;  %454 = vmatprep.mubr.msk.f32.mxu1 %vm598_vm0, %v597_v0  ;;  %v65_v4 = vmul.f32 0.17677669, %v59_v3  ;;  %v66_v6 = vmul.f32 0.17677669, %v60_v5  ;;  %v63_v23 = vld [vmem:[#allocation7] sm:$0xff]  ;;  %v64_v24 = vld [vmem:[#allocation7 + $0x8] sm:$0xff] }
  0x29   :  { %448 = vmatpush3.xpose.msk.msra.mxu0 %vm67_vm1, %v61_v1  ;;  %453 = vmatpush3.xpose.msk.msra.mxu1 %vm67_vm1, %v62_v2  ;;  %s416_s2 = sshll.u32 %s599_s0, 4  ;;  %s417_s2 = int_to_ptr.vmem [resolvable:$true] %s416_s2 }
  0x2a   :  { %457 = vmatprep.subr.mxu0 %v597_v0  ;;  %462 = vmatprep.subr.mxu1 %v597_v0  ;;  %s544_s5 = scalar_lea.vmem %s417_s2, 256  ;;  %p549_p2 = scmp.lt.s32.totalorder %s417_s2, %s417_s2 }
  0x2b   :  { %p545_p1 = scmp.ne.s32.totalorder %s417_s2, %s544_s5  ;;  %p550_p3 = scmp.lt.s32.totalorder %s544_s5, %s544_s5 }
  0x2c   :  { %450 = vmatmul.mubr.msk.f32.vlgmr.msra.gmra.mxu0 %vm67_vm1, %v65_v4  ;;  %455 = vmatmul.mubr.msk.f32.vlgmr.msra.gmra.mxu1 %vm67_vm1, %v66_v6 }
  0x2d   :  { %459 = vmatprep.mubr.msk.f32.mxu0 %vm598_vm0, %v597_v0  ;;  %464 = vmatprep.mubr.msk.f32.mxu1 %vm598_vm0, %v597_v0  ;;  %p551_p4 = por %p550_p3, %p549_p2 }
  0x2e   :  { %458 = vmatpush3.msra.mxu0 %v63_v23  ;;  %463 = vmatpush3.msra.mxu1 %v64_v24 }
  0x2f   :  { %p552_p5 = pnand %p551_p4, %p545_p1 }
  0xec   :  { %v140_v7 = vpop.f32.mrf.mxu0  ;;  %v216_v8 = vpop.f32.mrf.mxu1 }
  0xed   :  { %v221_v9 = vsel %vm220_vm2, %v140_v7, -inf  ;;  %v224_v12 = vsel %vm220_vm2, %v216_v8, -inf }
  0xee   :  { %222 = vmax.xlane.f32.xlu0 %v221_v9  ;;  %v451_v10 = vpop.f32.mrf.mxu0  ;;  %v456_v11 = vpop.f32.mrf.mxu1 }
  0xf2   :  { %225 = vmax.xlane.f32.xlu0 %v224_v12 }
 0x177   :  { %v223_v13 = vpop.xlane.xlu0 %222 }
 0x178   :  { %v227_v14 = vsub.f32 %v140_v7, %v223_v13 }
 0x17a   :  { %v229_v15 = vmul.f32 1.442695, %v227_v14 }
 0x17b   :  { %v226_v16 = vpop.xlane.xlu0 %225 }
 0x17c   :  { %476 = vpow2.f32 %v229_v15  ;;  %v228_v17 = vsub.f32 %v216_v8, %v226_v16 }
 0x17e   :  { %v231_v18 = vmul.f32 1.442695, %v228_v17 }
 0x180   :  { %478 = vpow2.f32 %v231_v18 }
 0x189   :  { %v477_v19 = vpop.eup %476 }
 0x18a   :  { %v233_v20 = vsel %vm220_vm2, %v477_v19, 0.0 }
 0x18b   :  { %234 = vadd.xlane.f32.xlu1 %v233_v20 }
 0x18d   :  { %v479_v21 = vpop.eup %478 }
 0x18e   :  { %v236_v22 = vsel %vm220_vm2, %v479_v21, 0.0 }
 0x18f   :  { %237 = vadd.xlane.f32.xlu1 %v236_v22 }
 0x214   :  { %v235_v25 = vpop.xlane.xlu1 %234 }
 0x215   :  { %480 = vrcp.f32 %v235_v25 }
 0x218   :  { %v238_v26 = vpop.xlane.xlu1 %237 }
 0x219   :  { %482 = vrcp.f32 %v238_v26 }
 0x222   :  { %v481_v27 = vpop.eup %480 }
 0x223   :  { %v241_v28 = vmul.f32 %v481_v27, %v235_v25 }
 0x225   :  { %v243_v29 = vsub.f32 2.0, %v241_v28 }
 0x226   :  { %v483_v30 = vpop.eup %482 }
 0x227   :  { %v245_v31 = vmul.f32 %v481_v27, %v243_v29  ;;  %v242_v32 = vmul.f32 %v483_v30, %v238_v26 }
 0x229   :  { %v247_v33 = vmul.f32 %v477_v19, %v245_v31  ;;  %v244_v34 = vsub.f32 2.0, %v242_v32 }
 0x22b   :  { %249 = vst.msk [vmem:[#allocation9] sm:$0xff] %vm220_vm2, %v247_v33  ;;  %v246_v35 = vmul.f32 %v483_v30, %v244_v34  ;;  %460 = vmatmul.mubr.msk.f32.vlgmr.msra.gmra.mxu0 %vm220_vm2, %v247_v33 }
 0x22d   :  { %v248_v36 = vmul.f32 %v479_v21, %v246_v35 }
 0x22f   :  { %250 = vst.msk [vmem:[#allocation9 + $0x8] sm:$0xff] %vm220_vm2, %v248_v36  ;;  %465 = vmatmul.mubr.msk.f32.vlgmr.msra.gmra.mxu1 %vm220_vm2, %v248_v36 }
 0x230   :  { %555 = shalt.err (!%p552_p5)
}
 0x231   :  { %422 = dma.vmem_to_hbm [thread:$0]  %s417_s2, 256, %s678_s4, [#allocation10], %s594_s20, %s594_s20, %s595_s21  }
 0x232   :  { %s600_s8 = smov [#allocation8]  }
 0x233   :  { %s404_s9 = sshll.u32 %s600_s8, 4  ;;  %s405_s9 = int_to_ptr.vmem [resolvable:$true] %s404_s9 }
 0x234   :  { %s564_s10 = scalar_lea.vmem %s405_s9, 256  ;;  %p569_p7 = scmp.lt.s32.totalorder %s405_s9, %s405_s9 }
 0x235   :  { %p565_p6 = scmp.ne.s32.totalorder %s405_s9, %s564_s10  ;;  %p570_p8 = scmp.lt.s32.totalorder %s564_s10, %s564_s10 }
 0x237   :  { %p571_p9 = por %p570_p8, %p569_p7 }
 0x239   :  { %p572_p10 = pnand %p571_p9, %p565_p6 }
 0x2eb   :  { %v320_v37 = vpop.f32.mrf.mxu0 }
 0x2ec   :  { %397 = vst.msk [vmem:[#allocation8] sm:$0xff] %vm67_vm1, %v320_v37 }
 0x2ed   :  { %v461_v38 = vpop.f32.mrf.mxu0 }
 0x2ef   :  { %v393_v39 = vpop.f32.mrf.mxu1 }
 0x2f0   :  { %398 = vst.msk [vmem:[#allocation8 + $0x8] sm:$0xff] %vm67_vm1, %v393_v39 }
 0x2f1   :  { %v466_v40 = vpop.f32.mrf.mxu1 }
 0x2f2   :  { %575 = shalt.err (!%p572_p10)
}
 0x2f3   :  { %410 = dma.vmem_to_hbm [thread:$0]  %s405_s9, 256, %s677_s3, [#allocation4], %s594_s20, %s594_s20, %s595_s21  }
 0x2f4   :  { %588 = dma.done.wait [#allocation4], 256  }
 0x2f5   :  { %589 = vsyncadd [#allocation4], 4294967040 }
 0x2f6   :  { %590 = dma.done.wait [#allocation10], 256  }
 0x2f7   :  { %591 = vsyncadd [#allocation10], 4294967040 }
 0x2f8   :  { %429 = vsyncpa [#allocation3], 1 }
 0x2f9   :  { %430 = vsyncpa [#allocation6], 1 }
 0x2fa   :  { %431 = vsyncpa [#allocation4], 1 }
 0x2fb   :  { %432 = vsyncpa [#allocation10], 1 }

</bundles_post_ra>
